<compile_context>
chip_gen: v7x
topology: tpu7x:2x2x1
jax: 0.10.0
libtpu: 0.0.40
codegen_flags: <defaults>
</compile_context>

<pallas_src>
import functools

import jax
import jax.numpy as jnp
from jax import lax
from jax.experimental import pallas as pl
from jax.experimental.pallas import tpu as pltpu


def _residual_stack_kernel(x_ref, w1_ref, w2_ref, o_ref, pad_ref,
                           *, H, WC, WChid, L):
    """Fused residual stack for one batch element (lane-dense layout).

    x_ref  : (1, H, W*C)          input block, element [h, w*C + c]
    w1_ref : (L, 3, W*C, W*Chid)  per-layer, per-dy block-banded 3x3 weights (bf16)
    w2_ref : (L, W*Chid, W*C)     per-layer block-diagonal 1x1 weights (bf16)
    o_ref  : (1, H, W*C)          output block
    pad_ref: (H+2, W*C) f32       row-padded scratch for the dy = -1/0/+1 bands
    """
    # Zero only the two padding rows; the interior rows are fully overwritten
    # every layer.  Done each grid step (2 vector-row stores, negligible) so it
    # is correct no matter how the parallel batch axis is split across cores.
    zrow = jnp.zeros((1, WC), jnp.float32)
    pad_ref[pl.ds(0, 1), :] = zrow
    pad_ref[pl.ds(H + 1, 1), :] = zrow

    x = x_ref[0].astype(jnp.float32)                      # residual stream, f32

    for l in range(L):                                    # unrolled; weights stay resident
        a = jnp.maximum(x, 0.0)                           # ReLU before the 3x3 conv
        pad_ref[pl.ds(1, H), :] = a                       # interior rows 1..H

        # Conv3x3 (pad=1) == sum over dy of  band_dy @ M1[dy]   (K = W*C)
        y = jnp.zeros((H, WChid), jnp.float32)
        for b in range(3):                                # b = dy + 1
            band = pad_ref[pl.ds(b, H), :].astype(jnp.bfloat16)
            y = y + jnp.dot(band, w1_ref[l, b],
                            preferred_element_type=jnp.float32)

        h = jnp.maximum(y, 0.0).astype(jnp.bfloat16)      # ReLU before the 1x1 conv
        x = x + jnp.dot(h, w2_ref[l],                     # Conv1x1 + residual add
                        preferred_element_type=jnp.float32)

    o_ref[0] = jnp.maximum(x, 0.0).astype(o_ref.dtype)    # final stack ReLU


def _fold_weights(params, W, C, Chid, dtype=jnp.bfloat16):
    """Fold PyTorch conv weights into lane-dense block-banded matmul weights.

    w1_fold[l, dy+1, wp*C + c, w*Chid + o] = w1[l][o, c, dy+1, (wp-w)+1]
        for |wp - w| <= 1, zero elsewhere (W-direction conv padding is implicit).
    w2_fold[l, w*Chid + o, w*C + c]        = w2[l][c, o]   (block diagonal).
    """
    w1_all, w2_all = [], []
    for (w1, w2) in params:
        per_dy = []
        for dy_i in range(3):
            m = jnp.zeros((W * C, W * Chid), jnp.float32)
            for dx_i in range(3):
                tap = jnp.transpose(w1[:, :, dy_i, dx_i])            # (Cin, Chid)
                band = jnp.eye(W, k=-(dx_i - 1), dtype=jnp.float32)  # rows wp = w + dx
                m = m + jnp.kron(band, tap)
            per_dy.append(m)
        w1_all.append(jnp.stack(per_dy))                             # (3, W*C, W*Chid)
        w2_mat = jnp.transpose(w2.reshape(w2.shape[0], Chid))        # (Chid, Cout)
        w2_all.append(jnp.kron(jnp.eye(W, dtype=jnp.float32), w2_mat))
    return (jnp.stack(w1_all).astype(dtype), jnp.stack(w2_all).astype(dtype))


def residual_stack_pallas(x_nchw, params):
    """params: list of (w1, w2) with PyTorch layouts
         w1: (Chid, Cin, 3, 3)   Conv2d 3x3, pad=1, no bias
         w2: (Cout, Chid, 1, 1)  Conv2d 1x1, no bias   (Cout == Cin for residual)
    """
    N, C, H, W = x_nchw.shape
    L = len(params)
    Chid = params[0][0].shape[0]
    WC, WChid = W * C, W * Chid

    w1_fold, w2_fold = _fold_weights(params, W, C, Chid)

    # NCHW -> NHWC -> lane-dense (N, H, W*C): element [n, h, w*C + c].
    x_lane = jnp.transpose(x_nchw, (0, 2, 3, 1)).reshape(N, H, WC)

    kernel = functools.partial(_residual_stack_kernel,
                               H=H, WC=WC, WChid=WChid, L=L)
    out = pl.pallas_call(
        kernel,
        out_shape=jax.ShapeDtypeStruct((N, H, WC), x_nchw.dtype),
        grid_spec=pltpu.PrefetchScalarGridSpec(
            num_scalar_prefetch=0,
            grid=(N,),
            in_specs=[
                pl.BlockSpec((1, H, WC), lambda b: (b, 0, 0)),
                pl.BlockSpec((L, 3, WC, WChid), lambda b: (0, 0, 0, 0)),
                pl.BlockSpec((L, WChid, WC), lambda b: (0, 0, 0)),
            ],
            out_specs=pl.BlockSpec((1, H, WC), lambda b: (b, 0, 0)),
            scratch_shapes=[pltpu.VMEM((H + 2, WC), jnp.float32)],
        ),
        compiler_params=pltpu.CompilerParams(
            dimension_semantics=("parallel",),
            vmem_limit_bytes=32 * 1024 * 1024,
        ),
    )(x_lane, w1_fold, w2_fold)

    return jnp.transpose(out.reshape(N, H, W, C), (0, 3, 1, 2))


def residual_stack_ref(x_nchw, params):
    """Pure-JAX f32 reference matching the PyTorch module exactly (NCHW)."""
    dn = ("NCHW", "OIHW", "NCHW")
    y = x_nchw
    for (w1, w2) in params:
        a = jax.nn.relu(y)
        c1 = lax.conv_general_dilated(a, w1, (1, 1), "SAME", dimension_numbers=dn)
        c2 = lax.conv_general_dilated(jax.nn.relu(c1), w2, (1, 1), "VALID",
                                      dimension_numbers=dn)
        y = y + c2
    return jax.nn.relu(y)


if __name__ == "__main__":
    # in_channels == num_hiddens (required for the residual add); W*C = 128
    # makes the lane-dense layout an exact vreg width.
    N, C, H, W = 2, 8, 16, 16
    num_hiddens = C
    num_residual_hiddens = 4
    num_residual_layers = 2

    key = jax.random.PRNGKey(0)
    kx, key = jax.random.split(key)
    x = jax.random.normal(kx, (N, C, H, W), dtype=jnp.float32)

    params = []
    for _ in range(num_residual_layers):
        k1, k2, key = jax.random.split(key, 3)
        w1 = 0.1 * jax.random.normal(
            k1, (num_residual_hiddens, C, 3, 3), dtype=jnp.float32)
        w2 = 0.1 * jax.random.normal(
            k2, (num_hiddens, num_residual_hiddens, 1, 1), dtype=jnp.float32)
        params.append((w1, w2))

    out = jax.block_until_ready(residual_stack_pallas(x, params))

    ref = residual_stack_ref(x, params)
    assert out.shape == ref.shape == (N, C, H, W)
    # bf16 matmul operands with f32 accumulation -> compare at bf16 tolerance.
    assert jnp.allclose(out, ref, atol=2e-2, rtol=2e-2), (
        float(jnp.max(jnp.abs(out - ref))))

    print("KERNEL_OK")
</pallas_src>

<mosaic_0001>
module attributes {stable_mosaic.version = 11 : i64} {
  func.func @_residual_stack_kernel(%arg0: i32, %arg1: memref<1x16x128xf32, #tpu.memory_space<vmem>>, %arg2: memref<2x3x128x64xbf16, #tpu.memory_space<vmem>>, %arg3: memref<2x64x128xbf16, #tpu.memory_space<vmem>>, %arg4: memref<1x16x128xf32, #tpu.memory_space<vmem>>, %arg5: memref<18x128xf32, #tpu.memory_space<vmem>>) attributes {dimension_semantics = [#tpu.dimension_semantics<parallel>], iteration_bounds = array<i64: 2>, scalar_prefetch = 0 : i64, scratch_operands = 1 : i64, tpu.core_type = #tpu.core_type<tc>, window_params = [{transform_indices = @transform_0, window_bounds = array<i64: 1, 16, 128>}, {pipeline_mode = #tpu.pipeline_mode<synchronous>, transform_indices = @transform_1, window_bounds = array<i64: 2, 3, 128, 64>}, {pipeline_mode = #tpu.pipeline_mode<synchronous>, transform_indices = @transform_2, window_bounds = array<i64: 2, 64, 128>}, {transform_indices = @transform_3, window_bounds = array<i64: 1, 16, 128>}]} {
    %cst = arith.constant 0.000000e+00 : f32
    %0 = vector.broadcast %cst : f32 to vector<1x128xf32>
    %c0 = arith.constant 0 : index
    %c0_0 = arith.constant 0 : index
    %1 = vector.load %arg5[%c0, %c0_0] : memref<18x128xf32, #tpu.memory_space<vmem>>, vector<1x128xf32>
    tpu.vector_store %arg5[%c0, %c0_0], %0 {strides = array<i32>} : memref<18x128xf32, #tpu.memory_space<vmem>>, vector<1x128xf32>,
    %c17 = arith.constant 17 : index
    %c0_1 = arith.constant 0 : index
    %2 = vector.load %arg5[%c17, %c0_1] : memref<18x128xf32, #tpu.memory_space<vmem>>, vector<1x128xf32>
    tpu.vector_store %arg5[%c17, %c0_1], %0 {strides = array<i32>} : memref<18x128xf32, #tpu.memory_space<vmem>>, vector<1x128xf32>,
    %c0_2 = arith.constant 0 : index
    %c0_3 = arith.constant 0 : index
    %c0_4 = arith.constant 0 : index
    %3 = vector.load %arg1[%c0_2, %c0_3, %c0_4] : memref<1x16x128xf32, #tpu.memory_space<vmem>>, vector<1x16x128xf32>
    %4 = vector.shape_cast %3 : vector<1x16x128xf32> to vector<16x128xf32>
    %cst_5 = arith.constant 0.000000e+00 : f32
    %5 = vector.broadcast %cst_5 : f32 to vector<16x128xf32>
    %6 = arith.maximumf %4, %5 : vector<16x128xf32>
    %c1 = arith.constant 1 : index
    %c0_6 = arith.constant 0 : index
    %7 = vector.load %arg5[%c1, %c0_6] : memref<18x128xf32, #tpu.memory_space<vmem>>, vector<16x128xf32>
    tpu.vector_store %arg5[%c1, %c0_6], %6 {strides = array<i32>} : memref<18x128xf32, #tpu.memory_space<vmem>>, vector<16x128xf32>,
    %cst_7 = arith.constant 0.000000e+00 : f32
    %8 = vector.broadcast %cst_7 : f32 to vector<16x64xf32>
    %c0_8 = arith.constant 0 : index
    %c0_9 = arith.constant 0 : index
    %9 = vector.load %arg5[%c0_8, %c0_9] : memref<18x128xf32, #tpu.memory_space<vmem>>, vector<16x128xf32>
    %10 = arith.truncf %9 : vector<16x128xf32> to vector<16x128xbf16>
    %c0_10 = arith.constant 0 : index
    %c0_11 = arith.constant 0 : index
    %c0_12 = arith.constant 0 : index
    %c0_13 = arith.constant 0 : index
    %11 = vector.load %arg2[%c0_10, %c0_11, %c0_12, %c0_13] : memref<2x3x128x64xbf16, #tpu.memory_space<vmem>>, vector<1x1x128x64xbf16>
    %12 = vector.shape_cast %11 : vector<1x1x128x64xbf16> to vector<128x64xbf16>
    %cst_14 = arith.constant dense<0.000000e+00> : vector<16x64xf32>
    %13 = tpu.matmul %10, %12, %cst_14 {dimension_numbers = #tpu.dot_dimension_numbers<[1], [0], [0], [1], [0, 0, 1, 1], [], []>} : vector<16x128xbf16>, vector<128x64xbf16>, vector<16x64xf32> -> vector<16x64xf32>
    %14 = arith.addf %8, %13 : vector<16x64xf32>
    %c1_15 = arith.constant 1 : index
    %c0_16 = arith.constant 0 : index
    %15 = vector.load %arg5[%c1_15, %c0_16] : memref<18x128xf32, #tpu.memory_space<vmem>>, vector<16x128xf32>
    %16 = arith.truncf %15 : vector<16x128xf32> to vector<16x128xbf16>
    %c0_17 = arith.constant 0 : index
    %c1_18 = arith.constant 1 : index
    %c0_19 = arith.constant 0 : index
    %c0_20 = arith.constant 0 : index
    %17 = vector.load %arg2[%c0_17, %c1_18, %c0_19, %c0_20] : memref<2x3x128x64xbf16, #tpu.memory_space<vmem>>, vector<1x1x128x64xbf16>
    %18 = vector.shape_cast %17 : vector<1x1x128x64xbf16> to vector<128x64xbf16>
    %cst_21 = arith.constant dense<0.000000e+00> : vector<16x64xf32>
    %19 = tpu.matmul %16, %18, %cst_21 {dimension_numbers = #tpu.dot_dimension_numbers<[1], [0], [0], [1], [0, 0, 1, 1], [], []>} : vector<16x128xbf16>, vector<128x64xbf16>, vector<16x64xf32> -> vector<16x64xf32>
    %20 = arith.addf %14, %19 : vector<16x64xf32>
    %c2 = arith.constant 2 : index
    %c0_22 = arith.constant 0 : index
    %21 = vector.load %arg5[%c2, %c0_22] : memref<18x128xf32, #tpu.memory_space<vmem>>, vector<16x128xf32>
    %22 = arith.truncf %21 : vector<16x128xf32> to vector<16x128xbf16>
    %c0_23 = arith.constant 0 : index
    %c2_24 = arith.constant 2 : index
    %c0_25 = arith.constant 0 : index
    %c0_26 = arith.constant 0 : index
    %23 = vector.load %arg2[%c0_23, %c2_24, %c0_25, %c0_26] : memref<2x3x128x64xbf16, #tpu.memory_space<vmem>>, vector<1x1x128x64xbf16>
    %24 = vector.shape_cast %23 : vector<1x1x128x64xbf16> to vector<128x64xbf16>
    %cst_27 = arith.constant dense<0.000000e+00> : vector<16x64xf32>
    %25 = tpu.matmul %22, %24, %cst_27 {dimension_numbers = #tpu.dot_dimension_numbers<[1], [0], [0], [1], [0, 0, 1, 1], [], []>} : vector<16x128xbf16>, vector<128x64xbf16>, vector<16x64xf32> -> vector<16x64xf32>
    %26 = arith.addf %20, %25 : vector<16x64xf32>
    %cst_28 = arith.constant 0.000000e+00 : f32
    %27 = vector.broadcast %cst_28 : f32 to vector<16x64xf32>
    %28 = arith.maximumf %26, %27 : vector<16x64xf32>
    %29 = arith.truncf %28 : vector<16x64xf32> to vector<16x64xbf16>
    %c0_29 = arith.constant 0 : index
    %c0_30 = arith.constant 0 : index
    %c0_31 = arith.constant 0 : index
    %30 = vector.load %arg3[%c0_29, %c0_30, %c0_31] : memref<2x64x128xbf16, #tpu.memory_space<vmem>>, vector<1x64x128xbf16>
    %31 = vector.shape_cast %30 : vector<1x64x128xbf16> to vector<64x128xbf16>
    %cst_32 = arith.constant dense<0.000000e+00> : vector<16x128xf32>
    %32 = tpu.matmul %29, %31, %cst_32 {dimension_numbers = #tpu.dot_dimension_numbers<[1], [0], [0], [1], [0, 0, 1, 1], [], []>} : vector<16x64xbf16>, vector<64x128xbf16>, vector<16x128xf32> -> vector<16x128xf32>
    %33 = arith.addf %4, %32 : vector<16x128xf32>
    %cst_33 = arith.constant 0.000000e+00 : f32
    %34 = vector.broadcast %cst_33 : f32 to vector<16x128xf32>
    %35 = arith.maximumf %33, %34 : vector<16x128xf32>
    %c1_34 = arith.constant 1 : index
    %c0_35 = arith.constant 0 : index
    %36 = vector.load %arg5[%c1_34, %c0_35] : memref<18x128xf32, #tpu.memory_space<vmem>>, vector<16x128xf32>
    tpu.vector_store %arg5[%c1_34, %c0_35], %35 {strides = array<i32>} : memref<18x128xf32, #tpu.memory_space<vmem>>, vector<16x128xf32>,
    %cst_36 = arith.constant 0.000000e+00 : f32
    %37 = vector.broadcast %cst_36 : f32 to vector<16x64xf32>
    %c0_37 = arith.constant 0 : index
    %c0_38 = arith.constant 0 : index
    %38 = vector.load %arg5[%c0_37, %c0_38] : memref<18x128xf32, #tpu.memory_space<vmem>>, vector<16x128xf32>
    %39 = arith.truncf %38 : vector<16x128xf32> to vector<16x128xbf16>
    %c1_39 = arith.constant 1 : index
    %c0_40 = arith.constant 0 : index
    %c0_41 = arith.constant 0 : index
    %c0_42 = arith.constant 0 : index
    %40 = vector.load %arg2[%c1_39, %c0_40, %c0_41, %c0_42] : memref<2x3x128x64xbf16, #tpu.memory_space<vmem>>, vector<1x1x128x64xbf16>
    %41 = vector.shape_cast %40 : vector<1x1x128x64xbf16> to vector<128x64xbf16>
    %cst_43 = arith.constant dense<0.000000e+00> : vector<16x64xf32>
    %42 = tpu.matmul %39, %41, %cst_43 {dimension_numbers = #tpu.dot_dimension_numbers<[1], [0], [0], [1], [0, 0, 1, 1], [], []>} : vector<16x128xbf16>, vector<128x64xbf16>, vector<16x64xf32> -> vector<16x64xf32>
    %43 = arith.addf %37, %42 : vector<16x64xf32>
    %c1_44 = arith.constant 1 : index
    %c0_45 = arith.constant 0 : index
    %44 = vector.load %arg5[%c1_44, %c0_45] : memref<18x128xf32, #tpu.memory_space<vmem>>, vector<16x128xf32>
    %45 = arith.truncf %44 : vector<16x128xf32> to vector<16x128xbf16>
    %c1_46 = arith.constant 1 : index
    %c1_47 = arith.constant 1 : index
    %c0_48 = arith.constant 0 : index
    %c0_49 = arith.constant 0 : index
    %46 = vector.load %arg2[%c1_46, %c1_47, %c0_48, %c0_49] : memref<2x3x128x64xbf16, #tpu.memory_space<vmem>>, vector<1x1x128x64xbf16>
    %47 = vector.shape_cast %46 : vector<1x1x128x64xbf16> to vector<128x64xbf16>
    %cst_50 = arith.constant dense<0.000000e+00> : vector<16x64xf32>
    %48 = tpu.matmul %45, %47, %cst_50 {dimension_numbers = #tpu.dot_dimension_numbers<[1], [0], [0], [1], [0, 0, 1, 1], [], []>} : vector<16x128xbf16>, vector<128x64xbf16>, vector<16x64xf32> -> vector<16x64xf32>
    %49 = arith.addf %43, %48 : vector<16x64xf32>
    %c2_51 = arith.constant 2 : index
    %c0_52 = arith.constant 0 : index
    %50 = vector.load %arg5[%c2_51, %c0_52] : memref<18x128xf32, #tpu.memory_space<vmem>>, vector<16x128xf32>
    %51 = arith.truncf %50 : vector<16x128xf32> to vector<16x128xbf16>
    %c1_53 = arith.constant 1 : index
    %c2_54 = arith.constant 2 : index
    %c0_55 = arith.constant 0 : index
    %c0_56 = arith.constant 0 : index
    %52 = vector.load %arg2[%c1_53, %c2_54, %c0_55, %c0_56] : memref<2x3x128x64xbf16, #tpu.memory_space<vmem>>, vector<1x1x128x64xbf16>
    %53 = vector.shape_cast %52 : vector<1x1x128x64xbf16> to vector<128x64xbf16>
    %cst_57 = arith.constant dense<0.000000e+00> : vector<16x64xf32>
    %54 = tpu.matmul %51, %53, %cst_57 {dimension_numbers = #tpu.dot_dimension_numbers<[1], [0], [0], [1], [0, 0, 1, 1], [], []>} : vector<16x128xbf16>, vector<128x64xbf16>, vector<16x64xf32> -> vector<16x64xf32>
    %55 = arith.addf %49, %54 : vector<16x64xf32>
    %cst_58 = arith.constant 0.000000e+00 : f32
    %56 = vector.broadcast %cst_58 : f32 to vector<16x64xf32>
    %57 = arith.maximumf %55, %56 : vector<16x64xf32>
    %58 = arith.truncf %57 : vector<16x64xf32> to vector<16x64xbf16>
    %c1_59 = arith.constant 1 : index
    %c0_60 = arith.constant 0 : index
    %c0_61 = arith.constant 0 : index
    %59 = vector.load %arg3[%c1_59, %c0_60, %c0_61] : memref<2x64x128xbf16, #tpu.memory_space<vmem>>, vector<1x64x128xbf16>
    %60 = vector.shape_cast %59 : vector<1x64x128xbf16> to vector<64x128xbf16>
    %cst_62 = arith.constant dense<0.000000e+00> : vector<16x128xf32>
    %61 = tpu.matmul %58, %60, %cst_62 {dimension_numbers = #tpu.dot_dimension_numbers<[1], [0], [0], [1], [0, 0, 1, 1], [], []>} : vector<16x64xbf16>, vector<64x128xbf16>, vector<16x128xf32> -> vector<16x128xf32>
    %62 = arith.addf %33, %61 : vector<16x128xf32>
    %cst_63 = arith.constant 0.000000e+00 : f32
    %63 = vector.broadcast %cst_63 : f32 to vector<16x128xf32>
    %64 = arith.maximumf %62, %63 : vector<16x128xf32>
    %c0_64 = arith.constant 0 : index
    %c0_65 = arith.constant 0 : index
    %c0_66 = arith.constant 0 : index
    %65 = vector.load %arg4[%c0_64, %c0_65, %c0_66] : memref<1x16x128xf32, #tpu.memory_space<vmem>>, vector<1x16x128xf32>
    %66 = vector.shape_cast %65 : vector<1x16x128xf32> to vector<16x128xf32>
    %67 = vector.shape_cast %64 : vector<16x128xf32> to vector<1x16x128xf32>
    tpu.vector_store %arg4[%c0_64, %c0_65, %c0_66], %67 {strides = array<i32>} : memref<1x16x128xf32, #tpu.memory_space<vmem>>, vector<1x16x128xf32>,
    return
  }
  func.func @transform_0(%arg0: i32) -> (i32, i32, i32) {
    %c0_i32 = arith.constant 0 : i32
    %c0_i32_0 = arith.constant 0 : i32
    %c0_i32_1 = arith.constant 0 : i32
    return %arg0, %c0_i32, %c0_i32_0 : i32, i32, i32
  }
  func.func @transform_1(%arg0: i32) -> (i32, i32, i32, i32) {
    %c0_i32 = arith.constant 0 : i32
    %c0_i32_0 = arith.constant 0 : i32
    %c0_i32_1 = arith.constant 0 : i32
    %c0_i32_2 = arith.constant 0 : i32
    %c0_i32_3 = arith.constant 0 : i32
    return %c0_i32, %c0_i32_0, %c0_i32_1, %c0_i32_2 : i32, i32, i32, i32
  }
  func.func @transform_2(%arg0: i32) -> (i32, i32, i32) {
    %c0_i32 = arith.constant 0 : i32
    %c0_i32_0 = arith.constant 0 : i32
    %c0_i32_1 = arith.constant 0 : i32
    %c0_i32_2 = arith.constant 0 : i32
    return %c0_i32, %c0_i32_0, %c0_i32_1 : i32, i32, i32
  }
  func.func @transform_3(%arg0: i32) -> (i32, i32, i32) {
    %c0_i32 = arith.constant 0 : i32
    %c0_i32_0 = arith.constant 0 : i32
    %c0_i32_1 = arith.constant 0 : i32
    return %arg0, %c0_i32, %c0_i32_0 : i32, i32, i32
  }
}

</mosaic_0001>

<bundles_post_ra>
// kernel: tpu_custom_call.1
= control target key start
LH: loop header
LB: loop body
LE: loop exit
PB: predicated region body
PF: predicated region fallthrough
CT: control target
= control target key end

     0   :  { %8 = vsyncpa [#allocation4], 0  ;;  %s2018_s0 = inlined_call_operand.vmem [shape: f32[2,16,128], index: 0, kind: input, shape index: {}]   ;;  %s2019_s1 = inlined_call_operand.vmem [shape: bf16[2,3,128,64], index: 1, kind: input, shape index: {}]   ;;  %s2020_s2 = inlined_call_operand.vmem [shape: bf16[2,64,128], index: 2, kind: input, shape index: {}]   ;;  %s2021_s3 = inlined_call_operand.hbm [shape: f32[2,16,128], index: 3, kind: output, shape index: {}]  }
   0x1   :  { %10 = vsyncpa [#allocation4 + $0x1], 0  ;;  %s1655_s12 = smov 0   ;;  %s1657_s13 = smov 0  }
   0x2   :  { %s1659_s14 = smov 0   ;;  %s1661_s15 = smov 0  }
   0x3 LB: > { %s1676_s16 = sadd.s32 4294967295, %s1628_s15   ;;  %s1083_s17 = sadd.s32 4294967294, %s1628_s15   ;;  %s1628_s15 = sphi %s1661_s15, %s2027_s15   ;;  %s1624_s14 = sphi %s1659_s14, %s2026_s14   ;;  %s1620_s13 = sphi %s1657_s13, %s2025_s13   ;;  %s1616_s12 = sphi %s1655_s12, %s2024_s12  }
   0x4   : > { %s1680_s18 = sadd.s32 1, %s1628_s15   ;;  %s91_s19 = sadd.s32 1, %s1624_s14 }
   0x5   : > { %s88_s20 = ssub.s32 %s1628_s15, %s1680_s18  ;;  %p101_p0 = scmp.ne.s32.totalorder %s1624_s14, %s1620_s13 }
   0x6   : > { %p89_p1 = scmp.eq.s32.totalorder %s88_s20, 0  ;;  %p102_p2 = scmp.eq.s32.totalorder %s1676_s16, 1 }
   0x7   : > { %p107_p3 = scmp.ne.s32.totalorder %s1620_s13, %s1616_s12  ;;  %p108_p4 = scmp.eq.s32.totalorder %s1083_s17, 1 }
   0x8   : > { %s1691_s21 = scalar_select %p89_p1, %s1624_s14, %s91_s19  }
   0x9   : > { %p1693_p5 = por %p102_p2, %p101_p0  ;;  %p1697_p6 = por %p108_p4, %p107_p3 }
   0xa   : > { %p1086_p7 = scmp.ge.s32.totalorder %s1628_s15, 1  ;;  %p140_p8 = scmp.lt.s32.totalorder %s1628_s15, 3 }
   0xc   : > { %p141_p9 = pnand %p1086_p7, %p140_p8 }
   0xd   : > { %v1510_v0 = vld [vmem:[%s2019_s1 + $0x40] sm:$0xff] (!%p141_p9)   ;;  %v1630_v1 = vmov (!%p141_p9), 0.0   ;;  %v1511_v2 = vld [vmem:[%s2019_s1 + $0x48] sm:$0xff] (!%p141_p9)   ;;  %vm1631_vm0 = vmmov (!%p141_p9), 0   ;;  %p164_p10 = scmp.lt.s32.totalorder (!%p141_p9), %s1676_s16, 1  ;;  %v1512_v3 = vld [vmem:[%s2019_s1 + $0x50] sm:$0xff] (!%p141_p9)  }
   0xe   : > { %144 = sbr.rel (%p141_p9) target bundleno = 1063 (0x427), region = 32  ;;  %1307 = vmatprep.subr.bf16.mxu0 (!%p141_p9), %v1630_v1  ;;  %170 = vst [vmem:[#allocation2] sm:$0x1] (!%p141_p9), %v1630_v1  ;;  %171 = vst [vmem:[#allocation2 + $0x11] sm:$0x1] (!%p141_p9), %v1630_v1  ;;  %1367 = vmatprep.subr.bf16.mxu1 (!%p141_p9), %v1630_v1  ;;  %v1513_v6 = vld [vmem:[%s2019_s1 + $0x58] sm:$0xff] (!%p141_p9)  }
   0xf   : > { %1308 = vmatpush3.bf16.msra.mxu0 (!%p141_p9), %v1510_v0  ;;  %1323 = vmatprep.mubr.msk.bf16.mxu0 (!%p141_p9), %vm1631_vm0, %v1630_v1  ;;  %v1514_v9 = vld [vmem:[%s2019_s1 + $0x60] sm:$0xff] (!%p141_p9)   ;;  %v1515_v10 = vld [vmem:[%s2019_s1 + $0x68] sm:$0xff] (!%p141_p9)   ;;  %v1516_v11 = vld [vmem:[%s2019_s1 + $0x70] sm:$0xff] (!%p141_p9)   ;;  %vm541_vm1 = vcmask (!%p141_p9), 523264   ;;  %s161_s6 = sand.u32 (!%p141_p9), 1, %s1620_s13   ;;  %s1242_s10 = sshll.u32 (!%p141_p9), %s1676_s16, 8 }
  0x10   : > { %1309 = vmatprep.subr.bf16.mxu0 (!%p141_p9), %v1630_v1  ;;  %1375 = vmatprep.mubr.msk.bf16.mxu1 (!%p141_p9), %vm1631_vm0, %v1630_v1  ;;  %v1517_v12 = vld [vmem:[%s2019_s1 + $0x78] sm:$0xff] (!%p141_p9)   ;;  %v1534_v13 = vld [vmem:[%s2020_s2] sm:$0xff] (!%p141_p9)   ;;  %v1535_v14 = vld [vmem:[%s2020_s2 + $0x8] sm:$0xff] (!%p141_p9)   ;;  %s1975_s19 = scalar_lea.hbm (!%p141_p9), %s2021_s3, %s1242_s10  ;;  %s1977_s20 = scalar_lea.sflag (!%p141_p9), [#allocation4], %s161_s6 }
  0x11   : > { %v1518_v15 = vld [vmem:[%s2019_s1] sm:$0xff] (!%p141_p9)   ;;  %1368 = vmatpush3.bf16.msra.mxu1 (!%p141_p9), %v1534_v13  ;;  %v1519_v17 = vld [vmem:[%s2019_s1 + $0x8] sm:$0xff] (!%p141_p9)   ;;  %v1520_v18 = vld [vmem:[%s2019_s1 + $0x10] sm:$0xff] (!%p141_p9)   ;;  %s1632_s24 = smov (!%p141_p9), [#allocation3]  }
  0x12   : > { %1369 = vmatprep.subr.bf16.mxu1 (!%p141_p9), %v1630_v1  ;;  %v1521_v19 = vld [vmem:[%s2019_s1 + $0x18] sm:$0xff] (!%p141_p9)   ;;  %v1522_v20 = vld [vmem:[%s2019_s1 + $0x20] sm:$0xff] (!%p141_p9)   ;;  %v1523_v21 = vld [vmem:[%s2019_s1 + $0x28] sm:$0xff] (!%p141_p9)   ;;  %s1570_s25 = sshll.u32 (!%p141_p9), %s1632_s24, 4  ;;  %s1571_s25 = int_to_ptr.vmem [resolvable:$false] %s1570_s25 }
  0x13   : > { %1310 = vmatpush3.bf16.msra.mxu0 (!%p141_p9), %v1511_v2  ;;  %v1524_v22 = vld [vmem:[%s2019_s1 + $0x30] sm:$0xff] (!%p141_p9)   ;;  %v1525_v23 = vld [vmem:[%s2019_s1 + $0x38] sm:$0xff] (!%p141_p9)   ;;  %v1526_v27 = vld [vmem:[%s2019_s1 + $0x80] sm:$0xff] (!%p141_p9)   ;;  %s1572_s26 = scalar_lea.vmem (!%p141_p9), %s1571_s25, 512 }
  0x14   : > { %1311 = vmatprep.subr.bf16.mxu0 (!%p141_p9), %v1630_v1  ;;  %v1527_v28 = vld [vmem:[%s2019_s1 + $0x88] sm:$0xff] (!%p141_p9)   ;;  %v1528_v29 = vld [vmem:[%s2019_s1 + $0x90] sm:$0xff] (!%p141_p9)   ;;  %v1529_v30 = vld [vmem:[%s2019_s1 + $0x98] sm:$0xff] (!%p141_p9)  }
  0x15   : > { %s165_s28 = scalar_select %p164_p10, %s1676_s16, 1  ;;  %1370 = vmatpush3.bf16.msra.mxu1 %v1535_v14  ;;  %v1530_v31 = vld [vmem:[%s2019_s1 + $0xa0] sm:$0xff]   ;;  %v1531_v32 = vld [vmem:[%s2019_s1 + $0xa8] sm:$0xff]   ;;  %v1532_v33 = vld [vmem:[%s2019_s1 + $0xb0] sm:$0xff]  }
  0x16   : > { %1371 = vmatprep.subr.bf16.mxu1 %v1630_v1  ;;  %v1533_v34 = vld [vmem:[%s2019_s1 + $0xb8] sm:$0xff]   ;;  %v1536_v38 = vld [vmem:[%s2020_s2 + $0x10] sm:$0xff]   ;;  %v1538_v46 = vld [vmem:[%s2019_s1 + $0x100] sm:$0xff]  }
  0x17   : > { %s1241_s4 = sshll.u32 %s165_s28, 4  ;;  %1312 = vmatpush3.bf16.msra.mxu0 %v1512_v3  ;;  %v1537_v39 = vld [vmem:[%s2020_s2 + $0x18] sm:$0xff]   ;;  %v1539_v48 = vld [vmem:[%s2019_s1 + $0x108] sm:$0xff]   ;;  %v1540_v49 = vld [vmem:[%s2019_s1 + $0x110] sm:$0xff]  }
  0x18   : > { %s168_s7 = scalar_lea.vmem %s2018_s0, %s1241_s4  ;;  %1313 = vmatprep.subr.bf16.mxu0 %v1630_v1  ;;  %v1541_v50 = vld [vmem:[%s2019_s1 + $0x118] sm:$0xff]   ;;  %v1542_v51 = vld [vmem:[%s2019_s1 + $0x120] sm:$0xff]   ;;  %v1543_v52 = vld [vmem:[%s2019_s1 + $0x128] sm:$0xff]  }
  0x19   : > { %v1727_v4 = vld [vmem:[%s168_s7] sm:$0xff]  ;;  %v1729_v5 = vld [vmem:[%s168_s7 + $0x8] sm:$0xff]  ;;  %1372 = vmatpush3.bf16.msra.mxu1 %v1536_v38  ;;  %v1544_v53 = vld [vmem:[%s2019_s1 + $0x130] sm:$0xff]   ;;  %s1087_s7 = sshll.u32 %s161_s6, 4 }
  0x1a   : > { %v174_v7 = vmax.f32 %v1727_v4, 0.0  ;;  %v175_v8 = vmax.f32 %v1729_v5, 0.0  ;;  %1373 = vmatprep.subr.bf16.mxu1 %v1630_v1  ;;  %v1545_v54 = vld [vmem:[%s2019_s1 + $0x138] sm:$0xff]   ;;  %v1562_v55 = vld [vmem:[%s2020_s2 + $0x20] sm:$0xff]   ;;  %v1563_v56 = vld [vmem:[%s2020_s2 + $0x28] sm:$0xff]   ;;  %s163_s8 = scalar_lea.vmem [#allocation3], %s1087_s7 }
  0x1b   : > { %1314 = vmatpush3.bf16.msra.mxu0 %v1513_v6  ;;  %v1546_v2 = vld [vmem:[%s2019_s1 + $0xc0] sm:$0xff]   ;;  %v1549_v6 = vld [vmem:[%s2019_s1 + $0xd8] sm:$0xff]   ;;  %s1021_s9 = sshll.u32 %s163_s8, 4  ;;  %s1970_s9 = int_to_ptr.vmem [resolvable:$true] %s1021_s9 }
  0x1c   : > { %176 = vst [vmem:[#allocation2 + $0x1] sm:$0xff] %v174_v7  ;;  %177 = vst [vmem:[#allocation2 + $0x9] sm:$0xff] %v175_v8  ;;  %1315 = vmatprep.subr.bf16.mxu0 %v1630_v1  ;;  %v199_v16 = vpack.c.bf16 %v175_v8, %v174_v7  ;;  %v1550_v7 = vld [vmem:[%s2019_s1 + $0xe0] sm:$0xff]   ;;  %v1551_v8 = vld [vmem:[%s2019_s1 + $0xe8] sm:$0xff]   ;;  %s1566_s16 = scalar_lea.vmem %s1970_s9, 256  ;;  %p1573_p0 = scmp.lt.s32.totalorder %s1970_s9, %s1571_s25 }
  0x1d   : > { %1374 = vmatpush3.bf16.msra.mxu1 %v1537_v39  ;;  %v1554_v13 = vld [vmem:[%s2019_s1 + $0x140] sm:$0xff]   ;;  %p1567_p11 = scmp.ne.s32.totalorder %s1970_s9, %s1566_s16  ;;  %p1574_p1 = scmp.lt.s32.totalorder %s1572_s26, %s1566_s16 }
  0x1e   : > { %1379 = vmatprep.subr.bf16.mxu1 %v1630_v1 }
  0x1f   : > { %1316 = vmatpush3.bf16.msra.mxu0 %v1514_v9  ;;  %v1552_v9 = vld [vmem:[%s2019_s1 + $0xf0] sm:$0xff]   ;;  %p1568_p12 = pnand %p1567_p11, %p1693_p5  ;;  %p1575_p2 = por %p1574_p1, %p1573_p0 }
  0x20   : > { %1317 = vmatprep.subr.bf16.mxu0 %v1630_v1 }
  0x21   : > { %p1569_p13 = pneg %p1568_p12 }
  0x23   : > { %1318 = vmatpush3.bf16.msra.mxu0 %v1515_v10  ;;  %v178_v24 = vld [vmem:[#allocation2] sm:$0xff]  ;;  %v179_v25 = vld [vmem:[#allocation2 + $0x8] sm:$0xff]  ;;  %v1553_v10 = vld [vmem:[%s2019_s1 + $0xf8] sm:$0xff]   ;;  %p1576_p3 = pnand %p1575_p2, %p1569_p13 }
  0x24   : > { %1319 = vmatprep.subr.bf16.mxu0 %v1630_v1  ;;  %v180_v26 = vpack.c.bf16 %v179_v25, %v178_v24  ;;  %v395_v35 = vld [vmem:[#allocation2 + $0x2] sm:$0xff]  ;;  %v396_v36 = vld [vmem:[#allocation2 + $0xa] sm:$0xff] }
  0x25   : > { %v397_v37 = vpack.c.bf16 %v396_v36, %v395_v35  ;;  %v1564_v25 = vld [vmem:[%s2020_s2 + $0x30] sm:$0xff]  }
  0x27   : > { %1320 = vmatpush3.bf16.msra.mxu0 %v1516_v11 }
  0x28   : > { %1321 = vmatprep.subr.bf16.mxu0 %v1630_v1 }
  0x2b   : > { %1322 = vmatpush3.bf16.msra.mxu0 %v1517_v12 }
  0x2c   : > { %1327 = vmatprep.subr.bf16.mxu0 %v1630_v1 }
  0x2e   : > { %1324 = vmatmul.mubr.bf16.vlgmr.msra.gmra.mrb[0].mxu0 %v199_v16  ;;  %v1556_v16 = vld [vmem:[%s2019_s1 + $0x150] sm:$0xff]  }
  0x2f   : > { %1328 = vmatpush3.bf16.msra.mxu0 %v1518_v15  ;;  %1343 = vmatprep.mubr.msk.bf16.mxu0 %vm1631_vm0, %v1630_v1  ;;  %v1555_v15 = vld [vmem:[%s2019_s1 + $0x148] sm:$0xff]  }
  0x30   : > { %1329 = vmatprep.subr.bf16.mxu0 %v1630_v1 }
  0x33   : > { %1330 = vmatpush3.bf16.msra.mxu0 %v1519_v17  ;;  %v1557_v17 = vld [vmem:[%s2019_s1 + $0x158] sm:$0xff]  }
  0x34   : > { %1331 = vmatprep.subr.bf16.mxu0 %v1630_v1 }
  0x37   : > { %1332 = vmatpush3.bf16.msra.mxu0 %v1520_v18  ;;  %v1558_v18 = vld [vmem:[%s2019_s1 + $0x160] sm:$0xff]  }
  0x38   : > { %1333 = vmatprep.subr.bf16.mxu0 %v1630_v1 }
  0x3b   : > { %1334 = vmatpush3.bf16.msra.mxu0 %v1521_v19  ;;  %v1559_v19 = vld [vmem:[%s2019_s1 + $0x168] sm:$0xff]  }
  0x3c   : > { %1335 = vmatprep.subr.bf16.mxu0 %v1630_v1 }
  0x3f   : > { %1336 = vmatpush3.bf16.msra.mxu0 %v1522_v20  ;;  %v1560_v20 = vld [vmem:[%s2019_s1 + $0x170] sm:$0xff]  }
  0x40   : > { %1337 = vmatprep.subr.bf16.mxu0 %v1630_v1 }
  0x43   : > { %1338 = vmatpush3.bf16.msra.mxu0 %v1523_v21  ;;  %v1561_v21 = vld [vmem:[%s2019_s1 + $0x178] sm:$0xff]  }
  0x44   : > { %1339 = vmatprep.subr.bf16.mxu0 %v1630_v1 }
  0x47   : > { %1340 = vmatpush3.bf16.msra.mxu0 %v1524_v22 }
  0x48   : > { %1341 = vmatprep.subr.bf16.mxu0 %v1630_v1 }
  0x4b   : > { %1342 = vmatpush3.bf16.msra.mxu0 %v1525_v23 }
  0x4c   : > { %1347 = vmatprep.subr.bf16.mxu0 %v1630_v1 }
  0x4e   : > { %1344 = vmatmul.mubr.bf16.vlgmr.msra.gmra.mrb[0].mxu0 %v180_v26  ;;  %v1565_v26 = vld [vmem:[%s2020_s2 + $0x38] sm:$0xff]  }
  0x4f   : > { %1348 = vmatpush3.bf16.msra.mxu0 %v1526_v27  ;;  %1363 = vmatprep.mubr.msk.bf16.mxu0 %vm1631_vm0, %v1630_v1 }
  0x50   : > { %1349 = vmatprep.subr.bf16.mxu0 %v1630_v1 }
  0x53   : > { %1350 = vmatpush3.bf16.msra.mxu0 %v1527_v28 }
  0x54   : > { %1351 = vmatprep.subr.bf16.mxu0 %v1630_v1 }
  0x57   : > { %1352 = vmatpush3.bf16.msra.mxu0 %v1528_v29 }
  0x58   : > { %1353 = vmatprep.subr.bf16.mxu0 %v1630_v1 }
  0x5b   : > { %1354 = vmatpush3.bf16.msra.mxu0 %v1529_v30 }
  0x5c   : > { %1355 = vmatprep.subr.bf16.mxu0 %v1630_v1 }
  0x5f   : > { %1356 = vmatpush3.bf16.msra.mxu0 %v1530_v31 }
  0x60   : > { %1357 = vmatprep.subr.bf16.mxu0 %v1630_v1 }
  0x63   : > { %1358 = vmatpush3.bf16.msra.mxu0 %v1531_v32 }
  0x64   : > { %1359 = vmatprep.subr.bf16.mxu0 %v1630_v1 }
  0x67   : > { %1360 = vmatpush3.bf16.msra.mxu0 %v1532_v33 }
  0x68   : > { %1361 = vmatprep.subr.bf16.mxu0 %v1630_v1 }
  0x6b   : > { %1362 = vmatpush3.bf16.msra.mxu0 %v1533_v34 }
  0x6c   : > { %1439 = vmatprep.subr.bf16.mxu0 %v1630_v1 }
  0x6e   : > { %1364 = vmatmul.mubr.bf16.vlgmr.msra.gmra.mrb[0].mxu0 %v397_v37 }
  0x6f   : > { %1447 = vmatprep.mubr.msk.bf16.mxu0 %vm1631_vm0, %v1630_v1  ;;  %1440 = vmatpush3.bf16.msra.mxu0 %v1562_v55 }
  0x70   : > { %1441 = vmatprep.subr.bf16.mxu0 %v1630_v1 }
  0x73   : > { %1442 = vmatpush3.bf16.msra.mxu0 %v1563_v56 }
  0x74   : > { %1443 = vmatprep.subr.bf16.mxu0 %v1630_v1 }
  0x77   : > { %1444 = vmatpush3.bf16.msra.mxu0 %v1564_v25 }
  0x78   : > { %1445 = vmatprep.subr.bf16.mxu0 %v1630_v1 }
  0x7b   : > { %1446 = vmatpush3.bf16.msra.mxu0 %v1565_v26 }
 0x141   : > { %v497_v40 = vpop.f32.mrb[0].mxu0 }
 0x142   : > { %v1365_v41 = vpop.f32.mrb[1].mxu0  ;;  %v506_v43 = vmax.f32 %v497_v40, 0.0 }
 0x143   : > { %v500_v42 = vpop.f32.mrb[2].mxu0 }
 0x144   : > { %v507_v44 = vmax.f32 %v500_v42, 0.0  ;;  %v1366_v45 = vpop.f32.mrb[3].mxu0 }
 0x146   : > { %v508_v47 = vpack.c.bf16 %v507_v44, %v506_v43 }
 0x148   : > { %1376 = vmatmul.mubr.msk.bf16.vlgmr.msra.gmra.mrb[0].mxu1 %vm541_vm1, %v508_v47 }
 0x149   : > { %1380 = vmatpush3.bf16.msra.mxu1 %v1538_v46  ;;  %1395 = vmatprep.mubr.msk.bf16.mxu1 %vm1631_vm0, %v1630_v1 }
 0x14a   : > { %1381 = vmatprep.subr.bf16.mxu1 %v1630_v1 }
 0x14d   : > { %1382 = vmatpush3.bf16.msra.mxu1 %v1539_v48 }
 0x14e   : > { %1383 = vmatprep.subr.bf16.mxu1 %v1630_v1 }
 0x151   : > { %1384 = vmatpush3.bf16.msra.mxu1 %v1540_v49 }
 0x152   : > { %1385 = vmatprep.subr.bf16.mxu1 %v1630_v1 }
 0x155   : > { %1386 = vmatpush3.bf16.msra.mxu1 %v1541_v50 }
 0x156   : > { %1387 = vmatprep.subr.bf16.mxu1 %v1630_v1 }
 0x159   : > { %1388 = vmatpush3.bf16.msra.mxu1 %v1542_v51 }
 0x15a   : > { %1389 = vmatprep.subr.bf16.mxu1 %v1630_v1 }
 0x15d   : > { %1390 = vmatpush3.bf16.msra.mxu1 %v1543_v52 }
 0x15e   : > { %1391 = vmatprep.subr.bf16.mxu1 %v1630_v1 }
 0x161   : > { %1392 = vmatpush3.bf16.msra.mxu1 %v1544_v53 }
 0x162   : > { %1393 = vmatprep.subr.bf16.mxu1 %v1630_v1 }
 0x165   : > { %1394 = vmatpush3.bf16.msra.mxu1 %v1545_v54 }
 0x166   : > { %1399 = vmatprep.subr.bf16.mxu1 %v1630_v1 }
 0x21b   : > { %v579_v57 = vpop.f32.mrb[0].mxu1 }
 0x21c   : > { %v1884_v58 = vadd.f32 %v579_v57, %v1727_v4  ;;  %v1377_v59 = vpop.f32.mrb[1].mxu1  ;;  %v1547_v4 = vld [vmem:[%s2019_s1 + $0xc8] sm:$0xff]  }
 0x21d   : > { %v582_v60 = vpop.f32.mrb[2].mxu1 }
 0x21e   : > { %v588_v61 = vmax.f32 %v1884_v58, 0.0  ;;  %v1888_v62 = vadd.f32 %v582_v60, %v1729_v5  ;;  %v1378_v63 = vpop.f32.mrb[3].mxu1  ;;  %v1548_v5 = vld [vmem:[%s2019_s1 + $0xd0] sm:$0xff]  }
 0x220   : > { %590 = vst [vmem:[#allocation2 + $0x1] sm:$0xff] %v588_v61  ;;  %v589_v0 = vmax.f32 %v1888_v62, 0.0 }
 0x222   : > { %591 = vst [vmem:[#allocation2 + $0x9] sm:$0xff] %v589_v0  ;;  %v614_v3 = vpack.c.bf16 %v589_v0, %v588_v61 }
 0x224   : > { %1396 = vmatmul.mubr.bf16.vlgmr.msra.gmra.mrb[4].mxu1 %v614_v3 }
 0x225   : > { %1400 = vmatpush3.bf16.msra.mxu1 %v1546_v2  ;;  %1415 = vmatprep.mubr.msk.bf16.mxu1 %vm1631_vm0, %v1630_v1 }
 0x226   : > { %1401 = vmatprep.subr.bf16.mxu1 %v1630_v1 }
 0x227   : > { %v592_v12 = vld [vmem:[#allocation2] sm:$0xff] }
 0x229   : > { %1402 = vmatpush3.bf16.msra.mxu1 %v1547_v4  ;;  %v593_v11 = vld [vmem:[#allocation2 + $0x8] sm:$0xff] }
 0x22a   : > { %1403 = vmatprep.subr.bf16.mxu1 %v1630_v1  ;;  %v594_v14 = vpack.c.bf16 %v593_v11, %v592_v12  ;;  %v810_v22 = vld [vmem:[#allocation2 + $0x2] sm:$0xff]  ;;  %v811_v23 = vld [vmem:[#allocation2 + $0xa] sm:$0xff] }
 0x22b   : > { %v812_v24 = vpack.c.bf16 %v811_v23, %v810_v22 }
 0x22d   : > { %1404 = vmatpush3.bf16.msra.mxu1 %v1548_v5 }
 0x22e   : > { %1405 = vmatprep.subr.bf16.mxu1 %v1630_v1 }
 0x231   : > { %1406 = vmatpush3.bf16.msra.mxu1 %v1549_v6 }
 0x232   : > { %1407 = vmatprep.subr.bf16.mxu1 %v1630_v1 }
 0x235   : > { %1408 = vmatpush3.bf16.msra.mxu1 %v1550_v7 }
 0x236   : > { %1409 = vmatprep.subr.bf16.mxu1 %v1630_v1 }
 0x239   : > { %1410 = vmatpush3.bf16.msra.mxu1 %v1551_v8 }
 0x23a   : > { %1411 = vmatprep.subr.bf16.mxu1 %v1630_v1 }
 0x23d   : > { %1412 = vmatpush3.bf16.msra.mxu1 %v1552_v9 }
 0x23e   : > { %1413 = vmatprep.subr.bf16.mxu1 %v1630_v1 }
 0x241   : > { %1414 = vmatpush3.bf16.msra.mxu1 %v1553_v10 }
 0x242   : > { %1419 = vmatprep.subr.bf16.mxu1 %v1630_v1 }
 0x244   : > { %1416 = vmatmul.mubr.bf16.vlgmr.msra.gmra.mrb[4].mxu1 %v594_v14 }
 0x245   : > { %1420 = vmatpush3.bf16.msra.mxu1 %v1554_v13  ;;  %1435 = vmatprep.mubr.msk.bf16.mxu1 %vm1631_vm0, %v1630_v1 }
 0x246   : > { %1421 = vmatprep.subr.bf16.mxu1 %v1630_v1 }
 0x249   : > { %1422 = vmatpush3.bf16.msra.mxu1 %v1555_v15 }
 0x24a   : > { %1423 = vmatprep.subr.bf16.mxu1 %v1630_v1 }
 0x24d   : > { %1424 = vmatpush3.bf16.msra.mxu1 %v1556_v16 }
 0x24e   : > { %1425 = vmatprep.subr.bf16.mxu1 %v1630_v1 }
 0x251   : > { %1426 = vmatpush3.bf16.msra.mxu1 %v1557_v17 }
 0x252   : > { %1427 = vmatprep.subr.bf16.mxu1 %v1630_v1 }
 0x255   : > { %1428 = vmatpush3.bf16.msra.mxu1 %v1558_v18 }
 0x256   : > { %1429 = vmatprep.subr.bf16.mxu1 %v1630_v1 }
 0x259   : > { %1430 = vmatpush3.bf16.msra.mxu1 %v1559_v19 }
 0x25a   : > { %1431 = vmatprep.subr.bf16.mxu1 %v1630_v1 }
 0x25d   : > { %1432 = vmatpush3.bf16.msra.mxu1 %v1560_v20 }
 0x25e   : > { %1433 = vmatprep.subr.bf16.mxu1 %v1630_v1 }
 0x261   : > { %1434 = vmatpush3.bf16.msra.mxu1 %v1561_v21 }
 0x264   : > { %1436 = vmatmul.mubr.bf16.vlgmr.msra.gmra.mrb[4].mxu1 %v812_v24 }
 0x337   : > { %v912_v27 = vpop.f32.mrb[4].mxu1 }
 0x338   : > { %v1437_v28 = vpop.f32.mrb[5].mxu1  ;;  %v921_v30 = vmax.f32 %v912_v27, 0.0 }
 0x339   : > { %v915_v29 = vpop.f32.mrb[6].mxu1 }
 0x33a   : > { %v922_v31 = vmax.f32 %v915_v29, 0.0  ;;  %v1438_v32 = vpop.f32.mrb[7].mxu1 }
 0x33c   : > { %v923_v33 = vpack.c.bf16 %v922_v31, %v921_v30 }
 0x33e   : > { %1448 = vmatmul.mubr.msk.bf16.vlgmr.msra.gmra.mrb[4].mxu0 %vm541_vm1, %v923_v33 }
 0x411   : > { %v994_v34 = vpop.f32.mrb[4].mxu0 }
 0x412   : > { %v1001_v1 = vadd.f32 %v994_v34, %v1884_v58  ;;  %v1449_v35 = vpop.f32.mrb[5].mxu0 }
 0x413   : > { %v997_v36 = vpop.f32.mrb[6].mxu0 }
 0x414   : > { %v1003_v37 = vmax.f32 %v1001_v1, 0.0  ;;  %v1002_v38 = vadd.f32 %v997_v36, %v1888_v62  ;;  %v1450_v39 = vpop.f32.mrb[7].mxu0 }
 0x416   : > { %1005 = vst [vmem:[%s163_s8] sm:$0xff] %v1003_v37  ;;  %v1004_v40 = vmax.f32 %v1002_v38, 0.0 }
 0x418   : > { %1006 = vst [vmem:[%s163_s8 + $0x8] sm:$0xff] %v1004_v40 }
 0x419   : > { %1579 = shalt.err (!%p1576_p3)
}
 0x41a   : > { %s1580_s27 = scalar_lea.hbm %s1975_s19, 256  ;;  %s1584_s30 = scalar_lea.hbm %s2021_s3, 512 }
 0x41b   : > { %p1581_p4 = scmp.ne.s32.totalorder %s1975_s19, %s1580_s27  ;;  %p1585_p9 = scmp.lt.u32.totalorder %s1975_s19, %s2021_s3 }
 0x41c   : > { %p1586_p10 = scmp.lt.u32.totalorder %s1584_s30, %s1580_s27  ;;  %p1588_p12 = scmp.lt.u32.totalorder %s1580_s27, %s1975_s19 }
 0x41d   : > { %p1582_p7 = pnand %p1581_p4, %p1693_p5 }
 0x41e   : > { %p1587_p11 = por %p1586_p10, %p1585_p9 }
 0x41f   : > { %p1583_p8 = pneg %p1582_p7 }
 0x420   : > { %p1589_p13 = por %p1588_p12, %p1587_p11 }
 0x422   : > { %p1590_p0 = pnand %p1589_p13, %p1583_p8 }
 0x424   : > { %1593 = shalt.err (!%p1590_p0)
}
 0x425   : > { %s1633_s6 = smov 128   ;;  %s1634_s7 = smov 8  }
 0x426   : > { %1467 = dma.vmem_to_hbm [thread:$0]  (%p1693_p5), %s1970_s9, 256, %s1975_s19, %s1977_s20, %s1633_s6, %s1633_s6, %s1634_s7  }
 0x427 PF: > { %p1473_p1 = scmp.ge.s32.totalorder %s1628_s15, 2  ;;  %s1036_s8 = sand.u32 1, %s1616_s12  }
 0x428   : > { %s1037_s10 = scalar_lea.sflag [#allocation4], %s1036_s8 }
 0x429   : > { %p1470_p2 = pnand %p1473_p1, %p1697_p6 }
 0x42b   : > { %1611 = dma.done.wait (!%p1470_p2), %s1037_s10, 256  }
 0x42c   : > { %1613 = vsyncadd (!%p1470_p2), %s1037_s10, 4294967040  ;;  %p13_p3 = scmp.ge.s32.totalorder %s1680_s18, 4   ;;  %s2024_s12 = smov %s1620_s13 }
 0x42d   : > { %s2025_s13 = smov %s1624_s14  ;;  %s2026_s14 = smov %s1691_s21 }
 0x42e   : > { %s2027_s15 = smov %s1680_s18  ;;  %15 = sbr.rel (!%p13_p3) target bundleno = 3 (0x3), region = 73 }
 0x435   :  { %1042 = vsyncpa [#allocation4], 1 }
 0x436   :  { %1044 = vsyncpa [#allocation4 + $0x1], 1 }

</bundles_post_ra>
